<compile_context>
chip_gen: v6e
topology: v6e:2x2x1
jax: 0.10.0
libtpu: 0.0.40
codegen_flags: <defaults>
</compile_context>

<pallas_src>
import math

import jax
import jax.numpy as jnp
from jax.experimental import pallas as pl
from jax.experimental.pallas import tpu as pltpu


# ----------------------------- kernels ------------------------------------- #

def _headwise_kernel_bias(x_ref, w_ref, b_ref, o_ref):
    # x_ref: (TM, G*ipf)  w_ref: (G*ipf, G*opf)  b_ref: (1, G*opf)  o_ref: (TM, G*opf)
    acc = jnp.dot(x_ref[...], w_ref[...], preferred_element_type=jnp.float32)
    acc = acc + b_ref[...].astype(jnp.float32)
    o_ref[...] = acc.astype(o_ref.dtype)


def _headwise_kernel_nobias(x_ref, w_ref, o_ref):
    acc = jnp.dot(x_ref[...], w_ref[...], preferred_element_type=jnp.float32)
    o_ref[...] = acc.astype(o_ref.dtype)


# --------------------------- packing helpers -------------------------------- #

def _choose_head_group(nhead, in_per_head, out_per_head):
    """Smallest G dividing nhead giving lane-dense (128-multiple) block widths."""
    for g in range(1, nhead + 1):
        if nhead % g:
            continue
        if (g * in_per_head) % 128 == 0 and (g * out_per_head) % 128 == 0:
            return g
    return nhead  # fall back: full-feature-dim blocks are always legal


def _pack_weight(weight, group):
    """(nhead, opf, ipf) -> (nhead//G, G*ipf, G*opf): transposed, block-diag per group."""
    nhead, opf, ipf = weight.shape
    w_t = jnp.transpose(weight, (0, 2, 1))  # (nhead, ipf, opf); done once, off hot path
    if group == 1:
        return w_t
    n_groups = nhead // group
    w_gt = w_t.reshape(n_groups, group, ipf, opf)
    eye = jnp.eye(group, dtype=w_t.dtype)
    # w_bd[g, j, i, k, o] = w_t[g*G+j, i, o] * (j == k)  -> block-diagonal in (j,i)x(k,o)
    w_bd = jnp.einsum("gjio,jk->gjiko", w_gt, eye)
    return w_bd.reshape(n_groups, group * ipf, group * opf)


def _choose_tm(m, g_in, g_out, itemsize, w_block_bytes,
               budget_bytes=30 * 1024 * 1024):
    """Largest M-tile keeping double-buffered x/out + resident weight under budget."""
    avail = budget_bytes - 2 * w_block_bytes
    per_row = 2 * (g_in + g_out) * itemsize  # double-buffered x row + out row
    cap = 2048 if itemsize <= 2 else 1024
    if avail <= per_row * 8:
        # TODO(synk): add a K-reduction grid axis (+accumulator) for very large
        # per-head weights instead of shrinking TM to the floor.
        tm = 8
    else:
        tm = avail // per_row
    tm = min(int(tm), cap, m)
    if tm >= m:
        return m
    return max(8, (tm // 8) * 8)


# ------------------------------ pallas call --------------------------------- #

def headwise_linear_pallas(x2d, w_packed, bias_flat=None, *, out_dtype=None):
    """x2d: (M, in_features); w_packed: (n_groups, G*ipf, G*opf); bias_flat: (1, out_features)."""
    m, in_features = x2d.shape
    n_groups, g_in, g_out = w_packed.shape
    assert in_features == n_groups * g_in
    out_features = n_groups * g_out
    out_dtype = x2d.dtype if out_dtype is None else out_dtype

    itemsize = x2d.dtype.itemsize
    w_block_bytes = g_in * g_out * w_packed.dtype.itemsize
    tm = _choose_tm(m, g_in, g_out, itemsize, w_block_bytes)

    # M innermost -> weight tile index unchanged across the sweep (stays in VMEM).
    grid = (n_groups, pl.cdiv(m, tm))

    in_specs = [
        pl.BlockSpec((tm, g_in), lambda g, i: (i, g)),
        pl.BlockSpec((pl.Squeezed(), g_in, g_out), lambda g, i: (g, 0, 0)),
    ]
    args = [x2d, w_packed]
    if bias_flat is not None:
        in_specs.append(pl.BlockSpec((1, g_out), lambda g, i: (0, g)))
        args.append(bias_flat)
        kernel = _headwise_kernel_bias
    else:
        kernel = _headwise_kernel_nobias

    return pl.pallas_call(
        kernel,
        out_shape=jax.ShapeDtypeStruct((m, out_features), out_dtype),
        grid_spec=pltpu.PrefetchScalarGridSpec(
            num_scalar_prefetch=0,
            grid=grid,
            in_specs=in_specs,
            out_specs=pl.BlockSpec((tm, g_out), lambda g, i: (i, g)),
        ),
        compiler_params=pltpu.CompilerParams(
            dimension_semantics=("parallel", "parallel"),
            vmem_limit_bytes=40 * 1024 * 1024,
        ),
    )(*args)


# ------------------------------- module ------------------------------------- #

class HeadWiseLinearJAX:
    """JAX/Pallas port of the PyTorch HeadWiseLinear module (forward only)."""

    def __init__(self, in_features, out_features, nhead, bias=True, key=None,
                 dtype=jnp.float32):
        assert in_features % nhead == 0 and out_features % nhead == 0
        in_per_head = in_features // nhead
        out_per_head = out_features // nhead
        if key is None:
            key = jax.random.PRNGKey(0)
        std = math.sqrt(2.0 / 5.0 / in_features)
        self.weight = (
            jax.random.normal(key, (nhead, out_per_head, in_per_head), dtype) * std
        )
        self.bias = jnp.zeros((nhead, out_per_head), dtype) if bias else None

        self.in_features = in_features
        self.out_features = out_features
        self.nhead = nhead
        self.in_per_head = in_per_head
        self.out_per_head = out_per_head

        # One-time packing (off the forward path).
        self.group = _choose_head_group(nhead, in_per_head, out_per_head)
        self.w_packed = _pack_weight(self.weight, self.group)
        self.bias_flat = (
            None if self.bias is None else self.bias.reshape(1, out_features)
        )

    def __call__(self, x, compute_dtype=None):
        out_dtype = x.dtype
        if x.shape[-1] == self.in_features:
            lead = x.shape[:-1]
        else:
            assert x.shape[-2:] == (self.nhead, self.in_per_head)
            lead = x.shape[:-2]
        m = math.prod(lead) if lead else 1
        x2d = x.reshape(m, self.in_features)  # layout-preserving: no HBM transpose
        if compute_dtype is not None:
            x2d = x2d.astype(compute_dtype)   # e.g. bf16 MXU feed, f32 accumulate
        w = self.w_packed.astype(x2d.dtype)
        b = self.bias_flat                    # kept full precision; kernel casts to f32
        out2d = headwise_linear_pallas(x2d, w, b, out_dtype=out_dtype)
        return out2d.reshape(*lead, self.nhead, self.out_per_head)


# -------------------------------- demo -------------------------------------- #

if __name__ == "__main__":
    # Small shapes consistent with the module: batch=2, seq=8, hidden=32, nhead=4.
    B, S = 2, 8
    in_features, out_features, nhead = 32, 32, 4

    key = jax.random.PRNGKey(0)
    k_x, k_w = jax.random.split(key)
    x = jax.random.normal(k_x, (B, S, in_features), jnp.float32)

    mod = HeadWiseLinearJAX(in_features, out_features, nhead, bias=True, key=k_w)
    out = jax.block_until_ready(mod(x))

    # Reference (mirrors torch.einsum('...hi,hoi->...ho') + bias).
    x_heads = x.reshape(B, S, nhead, in_features // nhead)
    ref = jnp.einsum("bshi,hoi->bsho", x_heads, mod.weight) + mod.bias
    assert out.shape == (B, S, nhead, out_features // nhead)
    assert jnp.allclose(out, ref, atol=1e-5, rtol=1e-5), (
        float(jnp.max(jnp.abs(out - ref)))
    )

    # Also exercise the bias=False path.
    mod_nb = HeadWiseLinearJAX(in_features, out_features, nhead, bias=False, key=k_w)
    out_nb = jax.block_until_ready(mod_nb(x))
    ref_nb = jnp.einsum("bshi,hoi->bsho", x_heads, mod_nb.weight)
    assert jnp.allclose(out_nb, ref_nb, atol=1e-5, rtol=1e-5), (
        float(jnp.max(jnp.abs(out_nb - ref_nb)))
    )

    print("KERNEL_OK")
</pallas_src>

<mosaic_0001>
module attributes {stable_mosaic.version = 11 : i64} {
  func.func @_headwise_kernel_bias(%arg0: i32, %arg1: i32, %arg2: memref<16x32xf32, #tpu.memory_space<vmem>>, %arg3: memref<1x32x32xf32, #tpu.memory_space<vmem>>, %arg4: memref<1x32xf32, #tpu.memory_space<vmem>>, %arg5: memref<16x32xf32, #tpu.memory_space<vmem>>) attributes {dimension_semantics = [#tpu.dimension_semantics<parallel>, #tpu.dimension_semantics<parallel>], iteration_bounds = array<i64: 1, 1>, scalar_prefetch = 0 : i64, scratch_operands = 0 : i64, tpu.core_type = #tpu.core_type<tc>, window_params = [{transform_indices = @transform_0, window_bounds = array<i64: 16, 32>}, {transform_indices = @transform_1, window_bounds = array<i64: 1, 32, 32>}, {transform_indices = @transform_2, window_bounds = array<i64: 1, 32>}, {transform_indices = @transform_3, window_bounds = array<i64: 16, 32>}]} {
    %c0 = arith.constant 0 : index
    %c0_0 = arith.constant 0 : index
    %0 = vector.load %arg2[%c0, %c0_0] : memref<16x32xf32, #tpu.memory_space<vmem>>, vector<16x32xf32>
    %c0_1 = arith.constant 0 : index
    %c0_2 = arith.constant 0 : index
    %c0_3 = arith.constant 0 : index
    %1 = vector.load %arg3[%c0_1, %c0_2, %c0_3] : memref<1x32x32xf32, #tpu.memory_space<vmem>>, vector<1x32x32xf32>
    %2 = vector.shape_cast %1 : vector<1x32x32xf32> to vector<32x32xf32>
    %cst = arith.constant dense<0.000000e+00> : vector<16x32xf32>
    %3 = tpu.matmul %0, %2, %cst {dimension_numbers = #tpu.dot_dimension_numbers<[1], [0], [0], [1], [0, 0, 1, 1], [], []>} : vector<16x32xf32>, vector<32x32xf32>, vector<16x32xf32> -> vector<16x32xf32>
    %c0_4 = arith.constant 0 : index
    %c0_5 = arith.constant 0 : index
    %4 = vector.load %arg4[%c0_4, %c0_5] : memref<1x32xf32, #tpu.memory_space<vmem>>, vector<1x32xf32>
    %5 = vector.broadcast %4 : vector<1x32xf32> to vector<16x32xf32>
    %6 = arith.addf %3, %5 : vector<16x32xf32>
    %c0_6 = arith.constant 0 : index
    %c0_7 = arith.constant 0 : index
    %7 = vector.load %arg5[%c0_6, %c0_7] : memref<16x32xf32, #tpu.memory_space<vmem>>, vector<16x32xf32>
    tpu.vector_store %arg5[%c0_6, %c0_7], %6 {strides = array<i32>} : memref<16x32xf32, #tpu.memory_space<vmem>>, vector<16x32xf32>,
    return
  }
  func.func @transform_0(%arg0: i32, %arg1: i32) -> (i32, i32) {
    %c0_i32 = arith.constant 0 : i32
    return %arg1, %arg0 : i32, i32
  }
  func.func @transform_1(%arg0: i32, %arg1: i32) -> (i32, i32, i32) {
    %c0_i32 = arith.constant 0 : i32
    %c0_i32_0 = arith.constant 0 : i32
    %c0_i32_1 = arith.constant 0 : i32
    return %arg0, %c0_i32, %c0_i32_0 : i32, i32, i32
  }
  func.func @transform_2(%arg0: i32, %arg1: i32) -> (i32, i32) {
    %c0_i32 = arith.constant 0 : i32
    %c0_i32_0 = arith.constant 0 : i32
    return %c0_i32, %arg0 : i32, i32
  }
  func.func @transform_3(%arg0: i32, %arg1: i32) -> (i32, i32) {
    %c0_i32 = arith.constant 0 : i32
    return %arg1, %arg0 : i32, i32
  }
}

</mosaic_0001>

<bundles_post_ra>
// kernel: tpu_custom_call.1
= control target key start
LH: loop header
LB: loop body
LE: loop exit
PB: predicated region body
PF: predicated region fallthrough
CT: control target
= control target key end

     0   :  { %8 = vsyncpa [#allocation3], 0  ;;  %s299_s0 = inlined_call_operand.hbm [shape: f32[16,32], index: 0, kind: input, shape index: {}]   ;;  %s300_s1 = inlined_call_operand.hbm [shape: f32[1,32,32], index: 1, kind: input, shape index: {}]   ;;  %s301_s2 = inlined_call_operand.vmem [shape: f32[1,32], index: 2, kind: input, shape index: {}]   ;;  %s302_s3 = inlined_call_operand.hbm [shape: f32[16,32], index: 3, kind: output, shape index: {}]  }
   0x1   :  { %9 = vsyncpa [#allocation6], 0 }
   0x2   :  { %10 = vsyncpa [#allocation4], 0  ;;  %s249_s12 = smov [#allocation2]  }
   0x3   :  { %s16_s13 = sshll.u32 %s249_s12, 4  ;;  %s17_s13 = int_to_ptr.vmem [resolvable:$true] %s16_s13 }
   0x4   :  { %s191_s14 = scalar_lea.vmem %s17_s13, 256  ;;  %p196_p1 = scmp.lt.s32.totalorder %s17_s13, %s17_s13 }
   0x5   :  { %p192_p0 = scmp.ne.s32.totalorder %s17_s13, %s191_s14  ;;  %p197_p2 = scmp.lt.s32.totalorder %s191_s14, %s191_s14 }
   0x7   :  { %p198_p3 = por %p197_p2, %p196_p1 }
   0x9   :  { %p199_p4 = pnand %p198_p3, %p192_p0 }
   0xb   :  { %202 = shalt.err (!%p199_p4)
}
   0xc   :  { %s250_s15 = smov 128   ;;  %s251_s16 = smov 8  }
   0xd   :  { %22 = dma.hbm_to_vmem [thread:$0]  %s299_s0, 256, %s17_s13, [#allocation3], %s250_s15, %s250_s15, %s251_s16  }
   0xe   :  { %s252_s19 = smov [#allocation5]  }
   0xf   :  { %s28_s20 = sshll.u32 %s252_s19, 4  ;;  %s29_s20 = int_to_ptr.vmem [resolvable:$true] %s28_s20 }
  0x10   :  { %s211_s21 = scalar_lea.vmem %s29_s20, 512  ;;  %p216_p6 = scmp.lt.s32.totalorder %s29_s20, %s29_s20 }
  0x11   :  { %p212_p5 = scmp.ne.s32.totalorder %s29_s20, %s211_s21  ;;  %p217_p7 = scmp.lt.s32.totalorder %s211_s21, %s211_s21 }
  0x13   :  { %p218_p8 = por %p217_p7, %p216_p6 }
  0x15   :  { %p219_p9 = pnand %p218_p8, %p212_p5 }
  0x17   :  { %222 = shalt.err (!%p219_p9)
}
  0x18   :  { %34 = dma.hbm_to_vmem [thread:$0]  %s300_s1, 512, %s29_s20, [#allocation6], %s250_s15, %s250_s15, %s251_s16  }
  0x19   :  { %243 = dma.done.wait [#allocation3], 256  }
  0x1a   :  { %244 = vsyncadd [#allocation3], 4294967040 }
  0x1b   :  { %245 = dma.done.wait [#allocation6], 512  }
  0x1c   :  { %246 = vsyncadd [#allocation6], 4294966784  ;;  %vm56_vm0 = vcmask 261120   ;;  %v48_v0 = vld [vmem:[#allocation5 + $0x18] sm:$0xff]  ;;  %v47_v1 = vld [vmem:[#allocation5 + $0x10] sm:$0xff]  ;;  %s253_s24 = smov [#allocation7]  }
  0x1d   :  { %167 = vmatprep.subr.mxu0 %v48_v0  ;;  %v43_v2 = vld [vmem:[#allocation2] sm:$0xff]  ;;  %v46_v3 = vld [vmem:[#allocation5 + $0x8] sm:$0xff]  ;;  %v45_v4 = vld [vmem:[#allocation5] sm:$0xff]  ;;  %s145_s25 = sshll.u32 %s253_s24, 4  ;;  %s146_s25 = int_to_ptr.vmem [resolvable:$true] %s145_s25 }
  0x1e   :  { %168 = vmatpush3.msra.mxu0 %v48_v0  ;;  %175 = vmatprep.mubr.msk.f32.mxu0 %vm56_vm0, %v43_v2  ;;  %v44_v5 = vld [vmem:[#allocation2 + $0x8] sm:$0xff]  ;;  %v158_v6 = vld [vmem:[%s301_s2] ss:$0 sm:$0xff]  ;;  %s223_s26 = scalar_lea.vmem %s146_s25, 256  ;;  %p228_p11 = scmp.lt.s32.totalorder %s146_s25, %s146_s25 }
  0x1f   :  { %169 = vmatprep.subr.mxu0 %v47_v1  ;;  %p224_p10 = scmp.ne.s32.totalorder %s146_s25, %s223_s26  ;;  %p229_p12 = scmp.lt.s32.totalorder %s223_s26, %s223_s26 }
  0x20   :  { %170 = vmatpush3.msra.mxu0 %v47_v1 }
  0x21   :  { %171 = vmatprep.subr.mxu0 %v46_v3  ;;  %p230_p13 = por %p229_p12, %p228_p11 }
  0x22   :  { %172 = vmatpush3.msra.mxu0 %v46_v3 }
  0x23   :  { %173 = vmatprep.subr.mxu0 %v45_v4  ;;  %p231_p0 = pnand %p230_p13, %p224_p10 }
  0x24   :  { %174 = vmatpush3.msra.mxu0 %v45_v4 }
  0x25   :  { %176 = vmatmul.mubr.msk.f32.vlgmr.msra.gmra.mxu0 %vm56_vm0, %v44_v5 }
  0xe5   :  { %v177_v7 = vpop.f32.mrf.mxu0 }
  0xe6   :  { %v135_v8 = vadd.f32 %v177_v7, %v158_v6 }
  0xe7   :  { %v129_v9 = vpop.f32.mrf.mxu0 }
  0xe8   :  { %139 = vst.msk [vmem:[#allocation7 + $0x8] sm:$0xff] %vm56_vm0, %v135_v8  ;;  %v130_v10 = vadd.f32 %v158_v6, %v129_v9 }
  0xea   :  { %138 = vst.msk [vmem:[#allocation7] sm:$0xff] %vm56_vm0, %v130_v10 }
  0xeb   :  { %234 = shalt.err (!%p231_p0)
}
  0xec   :  { %151 = dma.vmem_to_hbm [thread:$0]  %s146_s25, 256, %s302_s3, [#allocation4], %s250_s15, %s250_s15, %s251_s16  }
  0xed   :  { %247 = dma.done.wait [#allocation4], 256  }
  0xee   :  { %248 = vsyncadd [#allocation4], 4294967040 }
  0xef   :  { %155 = vsyncpa [#allocation3], 1 }
  0xf0   :  { %156 = vsyncpa [#allocation6], 1 }
  0xf1   :  { %157 = vsyncpa [#allocation4], 1 }

</bundles_post_ra>
